<compile_context>
chip_gen: v6e
topology: v6e:2x2x1
jax: 0.10.0
libtpu: 0.0.40
codegen_flags: <defaults>
</compile_context>

<pallas_src>
import functools

import jax
import jax.numpy as jnp
from jax import lax
from jax.experimental import pallas as pl
from jax.experimental.pallas import tpu as pltpu


def _gated_conv_kernel(p_ref, w_ref, b_ref, o_ref, *, p_valid):
    # p_ref: (nb, CKp, Pp)   bf16 im2col patches, lane axis = spatial (padded to 128)
    # w_ref: (2*Cout, CKp)   bf16, rows [0:Cout] = feature conv, [Cout:] = mask conv
    # b_ref: (2*Cout, 1)     f32
    # o_ref: (nb, Cout, Pp)  f32 (or bf16)
    nb, _, pp = p_ref.shape
    cout = o_ref.shape[1]

    w = w_ref[...]                      # hoisted: loaded once per grid step
    b = b_ref[...]
    inv_p = jnp.float32(1.0 / p_valid)
    padded = pp != p_valid              # static (trace-time) flag

    def body(i, carry):
        # One MXU call per batch sub-element; no lane concat, no wide f32 temporary.
        res = jnp.dot(w, p_ref[i], preferred_element_type=jnp.float32)   # (2C, Pp)
        res = res + b                                                     # lane bcast

        feats = res[:cout, :]                                 # static sublane slices
        gates = res[cout:, :]
        feats = jnp.where(feats >= 0, feats, 0.2 * feats)     # leaky_relu(0.2)
        gate = 0.5 * (jnp.tanh(0.5 * gates) + 1.0)            # sigmoid, single EUP op
        out = gate * feats                                    # (Cout, Pp) f32

        # InstanceNorm2d (affine=False, eps=1e-5, biased variance), centered two-pass
        # stats over the spatial (lane) axis; padded lanes masked out of the sums.
        if padded:
            lane = lax.broadcasted_iota(jnp.int32, out.shape, 1)
            valid = lane < p_valid
            out_v = jnp.where(valid, out, 0.0)
        else:
            out_v = out
        mean = jnp.sum(out_v, axis=-1, keepdims=True) * inv_p
        cen = out - mean
        cen_v = jnp.where(valid, cen, 0.0) if padded else cen
        var = jnp.sum(cen_v * cen_v, axis=-1, keepdims=True) * inv_p
        o_ref[i] = (cen * lax.rsqrt(var + 1e-5)).astype(o_ref.dtype)
        return carry

    lax.fori_loop(0, nb, body, 0, unroll=True)


def _round_up(x, m):
    return (x + m - 1) // m * m


def _vmem_capacity_bytes():
    try:
        cap = getattr(pltpu.get_tpu_info(), "vmem_capacity_bytes", None)
        if cap:
            return int(cap)
    except Exception:
        pass
    return 64 << 20   # conservative fallback (v7x per-TensorCore VMEM)


def gated_conv2d(x, w_feat, b_feat, w_mask, b_mask, *, stride, padding,
                 batch_block=None, out_dtype=jnp.float32):
    """x: (N, Cin, H, W) f32; w_*: (Cout, Cin, K, K); b_*: (Cout,). Returns (N, Cout, OH, OW)."""
    N, Cin, H, W = x.shape
    Cout, _, K, _ = w_feat.shape
    OH = (H + 2 * padding - K) // stride + 1
    OW = (W + 2 * padding - K) // stride + 1
    P = OH * OW
    CK = Cin * K * K
    CKp = _round_up(CK, 16)    # bf16 sublane packing -> no internal relayout
    Pp = _round_up(P, 128)     # lane-dense, full-width (unmasked) stores

    # --- glue: im2col in bf16, laid out (N, CK, P) so the lane axis is spatial ---
    # CK ordering matches weight.reshape(Cout, Cin*K*K): ci*K*K + kh*K + kw
    # TODO(synk): for large images, stream K*K shifted slices of the padded input into
    # the kernel (P-tiled, running-stat InstanceNorm) instead of materializing the
    # K*K-times larger im2col tensor in HBM (dominant HBM-traffic term).
    xb = x.astype(jnp.bfloat16)
    xp = jnp.pad(xb, ((0, 0), (0, 0), (padding, padding), (padding, padding)))
    cols = []
    for kh in range(K):
        for kw in range(K):
            cols.append(xp[:, :, kh:kh + (OH - 1) * stride + 1:stride,
                               kw:kw + (OW - 1) * stride + 1:stride])
    patches = jnp.stack(cols, axis=2).reshape(N, CK, P)                 # (N, CK, P) bf16
    if CKp != CK or Pp != P:
        patches = jnp.pad(patches, ((0, 0), (0, CKp - CK), (0, Pp - P)))

    # Fuse the two convolutions into one (2*Cout, CKp) weight / (2*Cout, 1) bias.
    w_all = jnp.concatenate([w_feat.reshape(Cout, CK),
                             w_mask.reshape(Cout, CK)], axis=0).astype(jnp.bfloat16)
    if CKp != CK:
        w_all = jnp.pad(w_all, ((0, 0), (0, CKp - CK)))
    b_all = jnp.concatenate([b_feat, b_mask]).reshape(2 * Cout, 1).astype(jnp.float32)

    vmem_cap = _vmem_capacity_bytes()

    # Batch sub-block per grid step: keep the grid >= min(4, N) steps so the DMA
    # pipeline overlaps and megacore (v7x) can shard the parallel axis, and keep the
    # per-step patch block within a generation-aware budget.
    if batch_block is None:
        budget = max(1 << 20, min(4 << 20, vmem_cap // 24))
        min_steps = min(4, N)
        batch_block = 1
        for nb_try in range(N, 0, -1):
            if N % nb_try or (N // nb_try) < min_steps:
                continue
            if nb_try * CKp * Pp * 2 <= budget:
                batch_block = nb_try
                break
    assert N % batch_block == 0
    nb = batch_block

    # VMEM estimate: double-buffered inputs/outputs + in-kernel f32 temporaries.
    out_elt = jnp.dtype(out_dtype).itemsize
    in_bytes = nb * CKp * Pp * 2 + (2 * Cout) * CKp * 2 + (2 * Cout) * 128 * 4
    out_bytes = nb * Cout * Pp * out_elt
    tmp_bytes = 6 * (2 * Cout) * Pp * 4
    want = 2 * (in_bytes + out_bytes) + tmp_bytes + (4 << 20)
    vmem_limit = int(min(int(vmem_cap * 0.8), max(16 << 20, want)))

    kernel = functools.partial(_gated_conv_kernel, p_valid=P)
    out = pl.pallas_call(
        kernel,
        out_shape=jax.ShapeDtypeStruct((N, Cout, Pp), out_dtype),
        grid_spec=pltpu.PrefetchScalarGridSpec(
            num_scalar_prefetch=0,
            grid=(N // nb,),
            in_specs=[
                pl.BlockSpec((nb, CKp, Pp), lambda g: (g, 0, 0)),
                pl.BlockSpec((2 * Cout, CKp), lambda g: (0, 0)),
                pl.BlockSpec((2 * Cout, 1), lambda g: (0, 0)),
            ],
            out_specs=pl.BlockSpec((nb, Cout, Pp), lambda g: (g, 0, 0)),
        ),
        compiler_params=pltpu.CompilerParams(
            dimension_semantics=("parallel",),
            vmem_limit_bytes=vmem_limit),
    )(patches, w_all, b_all)

    if Pp != P:
        out = out[:, :, :P]
    # Lane axis is OH*OW: straight reshape to NCHW, no output transpose.
    return out.reshape(N, Cout, OH, OW)


def _reference(x, w_feat, b_feat, w_mask, b_mask, *, stride, padding):
    """Pure-f32 reference matching the PyTorch GatedConv2d forward."""
    dn = lax.conv_dimension_numbers(x.shape, w_feat.shape, ("NCHW", "OIHW", "NCHW"))

    def conv(w, b):
        y = lax.conv_general_dilated(x, w, (stride, stride),
                                     [(padding, padding), (padding, padding)],
                                     dimension_numbers=dn)
        return y + b[None, :, None, None]

    feats = conv(w_feat, b_feat)
    feats = jnp.where(feats >= 0, feats, 0.2 * feats)
    mask = jax.nn.sigmoid(conv(w_mask, b_mask))
    out = mask * feats
    mean = out.mean(axis=(2, 3), keepdims=True)
    var = ((out - mean) ** 2).mean(axis=(2, 3), keepdims=True)
    return (out - mean) * lax.rsqrt(var + 1e-5)


if __name__ == "__main__":
    key = jax.random.PRNGKey(0)
    N, Cin, H, W = 2, 4, 16, 16
    Cout, K, stride, padding = 8, 3, 1, 1

    # Equalized-LR init: use_wscale=False, lrmul=1 -> init_std = he_std, w_lrmul = 1
    gain = 2 ** 0.5
    he_std = gain * (Cin * K ** 2) ** (-0.5)
    k1, k2, k3 = jax.random.split(key, 3)
    x = jax.random.normal(k1, (N, Cin, H, W), dtype=jnp.float32)
    w_feat = jax.random.normal(k2, (Cout, Cin, K, K), dtype=jnp.float32) * he_std
    w_mask = jax.random.normal(k3, (Cout, Cin, K, K), dtype=jnp.float32) * he_std
    b_feat = jnp.zeros((Cout,), dtype=jnp.float32)   # bias init is zeros in the module
    b_mask = jnp.zeros((Cout,), dtype=jnp.float32)

    out = gated_conv2d(x, w_feat, b_feat, w_mask, b_mask,
                       stride=stride, padding=padding)
    out = jax.block_until_ready(out)

    ref = _reference(x, w_feat, b_feat, w_mask, b_mask,
                     stride=stride, padding=padding)
    assert out.shape == (N, Cout, H, W)
    # Tolerance accounts for bf16 matmul inputs (the reference convs run in f32).
    err = float(jnp.max(jnp.abs(out - ref)))
    assert err < 5e-2, f"max abs err {err}"

    print("KERNEL_OK")
</pallas_src>

<mosaic_0001>
module attributes {stable_mosaic.version = 11 : i64} {
  func.func @_gated_conv_kernel(%arg0: i32, %arg1: memref<1x48x256xbf16, #tpu.memory_space<vmem>>, %arg2: memref<16x48xbf16, #tpu.memory_space<vmem>>, %arg3: memref<16x1xf32, #tpu.memory_space<vmem>>, %arg4: memref<1x8x256xf32, #tpu.memory_space<vmem>>) attributes {dimension_semantics = [#tpu.dimension_semantics<parallel>], iteration_bounds = array<i64: 2>, scalar_prefetch = 0 : i64, scratch_operands = 0 : i64, tpu.core_type = #tpu.core_type<tc>, window_params = [{transform_indices = @transform_0, window_bounds = array<i64: 1, 48, 256>}, {pipeline_mode = #tpu.pipeline_mode<synchronous>, transform_indices = @transform_1, window_bounds = array<i64: 16, 48>}, {pipeline_mode = #tpu.pipeline_mode<synchronous>, transform_indices = @transform_2, window_bounds = array<i64: 16, 1>}, {transform_indices = @transform_3, window_bounds = array<i64: 1, 8, 256>}]} {
    %c0 = arith.constant 0 : index
    %c0_0 = arith.constant 0 : index
    %0 = vector.load %arg2[%c0, %c0_0] : memref<16x48xbf16, #tpu.memory_space<vmem>>, vector<16x48xbf16>
    %c0_1 = arith.constant 0 : index
    %c0_2 = arith.constant 0 : index
    %1 = vector.load %arg3[%c0_1, %c0_2] : memref<16x1xf32, #tpu.memory_space<vmem>>, vector<16x1xf32>
    %cst = arith.constant 3.906250e-03 : f32
    %c0_i32 = arith.constant 0 : i32
    %2 = arith.index_cast %c0_i32 : i32 to index
    %c0_3 = arith.constant 0 : index
    %c0_4 = arith.constant 0 : index
    %3 = vector.load %arg1[%2, %c0_3, %c0_4] : memref<1x48x256xbf16, #tpu.memory_space<vmem>>, vector<1x48x256xbf16>
    %4 = vector.shape_cast %3 : vector<1x48x256xbf16> to vector<48x256xbf16>
    %cst_5 = arith.constant dense<0.000000e+00> : vector<16x256xf32>
    %5 = tpu.matmul %0, %4, %cst_5 {dimension_numbers = #tpu.dot_dimension_numbers<[1], [0], [0], [1], [0, 0, 1, 1], [], []>} : vector<16x48xbf16>, vector<48x256xbf16>, vector<16x256xf32> -> vector<16x256xf32>
    %6 = vector.broadcast %1 : vector<16x1xf32> to vector<16x256xf32>
    %7 = arith.addf %5, %6 : vector<16x256xf32>
    %8 = vector.extract_strided_slice %7 {offsets = [0, 0], sizes = [8, 256], strides = [1, 1]} : vector<16x256xf32> to vector<8x256xf32>
    %9 = vector.extract_strided_slice %7 {offsets = [8, 0], sizes = [8, 256], strides = [1, 1]} : vector<16x256xf32> to vector<8x256xf32>
    %cst_6 = arith.constant 0.000000e+00 : f32
    %10 = vector.broadcast %cst_6 : f32 to vector<8x256xf32>
    %11 = arith.cmpf oge, %8, %10 : vector<8x256xf32>
    %cst_7 = arith.constant 2.000000e-01 : f32
    %12 = vector.broadcast %cst_7 : f32 to vector<8x256xf32>
    %13 = arith.mulf %12, %8 : vector<8x256xf32>
    %14 = arith.select %11, %8, %13 : vector<8x256xi1>, vector<8x256xf32>
    %cst_8 = arith.constant 5.000000e-01 : f32
    %15 = vector.broadcast %cst_8 : f32 to vector<8x256xf32>
    %16 = arith.mulf %15, %9 : vector<8x256xf32>
    %17 = math.tanh %16 : vector<8x256xf32>
    %cst_9 = arith.constant 1.000000e+00 : f32
    %18 = vector.broadcast %cst_9 : f32 to vector<8x256xf32>
    %19 = arith.addf %17, %18 : vector<8x256xf32>
    %cst_10 = arith.constant 5.000000e-01 : f32
    %20 = vector.broadcast %cst_10 : f32 to vector<8x256xf32>
    %21 = arith.mulf %20, %19 : vector<8x256xf32>
    %22 = arith.mulf %21, %14 : vector<8x256xf32>
    %cst_11 = arith.constant dense<0.000000e+00> : vector<8xf32>
    %23 = vector.multi_reduction <add>, %22, %cst_11 [1] : vector<8x256xf32> to vector<8xf32>
    %24 = vector.shape_cast %23 : vector<8xf32> to vector<8x1xf32>
    %25 = vector.broadcast %cst : f32 to vector<8x1xf32>
    %26 = arith.mulf %24, %25 : vector<8x1xf32>
    %27 = vector.broadcast %26 : vector<8x1xf32> to vector<8x256xf32>
    %28 = arith.subf %22, %27 : vector<8x256xf32>
    %29 = arith.mulf %28, %28 : vector<8x256xf32>
    %cst_12 = arith.constant dense<0.000000e+00> : vector<8xf32>
    %30 = vector.multi_reduction <add>, %29, %cst_12 [1] : vector<8x256xf32> to vector<8xf32>
    %31 = vector.shape_cast %30 : vector<8xf32> to vector<8x1xf32>
    %32 = vector.broadcast %cst : f32 to vector<8x1xf32>
    %33 = arith.mulf %31, %32 : vector<8x1xf32>
    %cst_13 = arith.constant 9.99999974E-6 : f32
    %34 = vector.broadcast %cst_13 : f32 to vector<8x1xf32>
    %35 = arith.addf %33, %34 : vector<8x1xf32>
    %36 = math.rsqrt %35 : vector<8x1xf32>
    %37 = vector.broadcast %36 : vector<8x1xf32> to vector<8x256xf32>
    %38 = arith.mulf %28, %37 : vector<8x256xf32>
    %39 = arith.index_cast %c0_i32 : i32 to index
    %c0_14 = arith.constant 0 : index
    %c0_15 = arith.constant 0 : index
    %40 = vector.load %arg4[%39, %c0_14, %c0_15] : memref<1x8x256xf32, #tpu.memory_space<vmem>>, vector<1x8x256xf32>
    %41 = vector.shape_cast %40 : vector<1x8x256xf32> to vector<8x256xf32>
    %42 = vector.shape_cast %38 : vector<8x256xf32> to vector<1x8x256xf32>
    tpu.vector_store %arg4[%39, %c0_14, %c0_15], %42 {strides = array<i32>} : memref<1x8x256xf32, #tpu.memory_space<vmem>>, vector<1x8x256xf32>,
    %c1_i32 = arith.constant 1 : i32
    return
  }
  func.func @transform_0(%arg0: i32) -> (i32, i32, i32) {
    %c0_i32 = arith.constant 0 : i32
    %c0_i32_0 = arith.constant 0 : i32
    %c0_i32_1 = arith.constant 0 : i32
    return %arg0, %c0_i32, %c0_i32_0 : i32, i32, i32
  }
  func.func @transform_1(%arg0: i32) -> (i32, i32) {
    %c0_i32 = arith.constant 0 : i32
    %c0_i32_0 = arith.constant 0 : i32
    %c0_i32_1 = arith.constant 0 : i32
    return %c0_i32, %c0_i32_0 : i32, i32
  }
  func.func @transform_2(%arg0: i32) -> (i32, i32) {
    %c0_i32 = arith.constant 0 : i32
    %c0_i32_0 = arith.constant 0 : i32
    %c0_i32_1 = arith.constant 0 : i32
    return %c0_i32, %c0_i32_0 : i32, i32
  }
  func.func @transform_3(%arg0: i32) -> (i32, i32, i32) {
    %c0_i32 = arith.constant 0 : i32
    %c0_i32_0 = arith.constant 0 : i32
    %c0_i32_1 = arith.constant 0 : i32
    return %arg0, %c0_i32, %c0_i32_0 : i32, i32, i32
  }
}

</mosaic_0001>

<bundles_post_ra>
// kernel: tpu_custom_call.1
= control target key start
LH: loop header
LB: loop body
LE: loop exit
PB: predicated region body
PF: predicated region fallthrough
CT: control target
= control target key end

     0   :  { %8 = vsyncpa [#allocation3], 0  ;;  %s769_s0 = inlined_call_operand.hbm [shape: bf16[2,48,256], index: 0, kind: input, shape index: {}]   ;;  %s770_s1 = inlined_call_operand.vmem [shape: bf16[16,48], index: 1, kind: input, shape index: {}]   ;;  %s771_s2 = inlined_call_operand.vmem [shape: f32[16,1], index: 2, kind: input, shape index: {}]   ;;  %s772_s3 = inlined_call_operand.hbm [shape: f32[2,8,256], index: 3, kind: output, shape index: {}]  }
   0x1   :  { %10 = vsyncpa [#allocation3 + $0x1], 0 }
   0x2   :  { %11 = vsyncpa [#allocation4], 0 }
   0x3   :  { %13 = vsyncpa [#allocation4 + $0x1], 0  ;;  %s619_s12 = smov 0   ;;  %s621_s13 = smov 0  }
   0x4   :  { %s623_s14 = smov 0   ;;  %s625_s15 = smov 0  }
   0x5 LB: > { %s640_s16 = sadd.s32 4294967295, %s592_s15   ;;  %s411_s17 = sadd.s32 4294967294, %s592_s15   ;;  %s592_s15 = sphi %s625_s15, %s786_s15   ;;  %s588_s14 = sphi %s623_s14, %s785_s14   ;;  %s584_s13 = sphi %s621_s13, %s784_s13   ;;  %s580_s12 = sphi %s619_s12, %s783_s12  }
   0x6   : > { %s644_s18 = sadd.s32 1, %s592_s15   ;;  %s26_s19 = sadd.s32 1, %s588_s14 }
   0x7   : > { %s23_s20 = ssub.s32 %s592_s15, %s644_s18  ;;  %p33_p0 = scmp.ne.s32.totalorder %s588_s14, %s584_s13 }
   0x8   : > { %p24_p1 = scmp.eq.s32.totalorder %s23_s20, 0  ;;  %p34_p2 = scmp.eq.s32.totalorder %s592_s15, 0 }
   0x9   : > { %p39_p3 = scmp.ne.s32.totalorder %s584_s13, %s580_s12  ;;  %p40_p4 = scmp.eq.s32.totalorder %s640_s16, 0 }
   0xa   : > { %s656_s21 = scalar_select %p24_p1, %s588_s14, %s26_s19  }
   0xb   : > { %p35_p5 = por %p34_p2, %p33_p0  ;;  %p658_p6 = por %p40_p4, %p39_p3 }
   0xc   : > { %p105_p7 = scmp.eq.s32.totalorder %s640_s16, 1  ;;  %p111_p8 = scmp.eq.s32.totalorder %s411_s17, 1 }
   0xd   : > { %s775_s22 = scalar_select %p658_p6, 1, 0 }
   0xe   : > { %p446_p10 = scmp.lt.s32.totalorder %s592_s15, 2  ;;  %p665_p11 = por %p105_p7, %p33_p0 }
   0xf   : > { %p669_p12 = por %p111_p8, %p39_p3  ;;  %s137_s25 = sand.u32 1, %s588_s14  }
  0x10   : > { %s776_s23 = scalar_select %p665_p11, 1, 0 }
  0x11   : > { %s777_s24 = scalar_select %p669_p12, 1, 0 }
  0x12   : > { %s432_s26 = smul.u32 768, %s592_s15  ;;  %p680_p13 = pnand %p446_p10, %p35_p5 }
  0x13   : > { %s431_s27 = smul.u32 48, %s137_s25  ;;  %s686_s7 = scalar_lea.sflag [#allocation3], %s137_s25 }
  0x14   : > { %s678_s30 = scalar_lea.hbm %s769_s0, %s432_s26  ;;  %p502_p1 = pneg %p680_p13 }
  0x15   : > { %s141_s5 = scalar_lea.vmem [#allocation2], %s431_s27  ;;  %s500_s8 = scalar_lea.hbm %s678_s30, 768 }
  0x16   : > { %s148_s6 = sshll.u32 %s141_s5, 4  ;;  %p501_p0 = scmp.ne.s32.totalorder %s678_s30, %s500_s8  ;;  %s684_s6 = int_to_ptr.vmem [resolvable:$true] %s148_s6 }
  0x17   : > { %s505_s11 = scalar_lea.hbm %s769_s0, 1536  ;;  %p506_p4 = scmp.lt.s32.totalorder %s678_s30, %s769_s0 }
  0x18   : > { %p503_p2 = pnand %p502_p1, %p501_p0  ;;  %p507_p5 = scmp.lt.s32.totalorder %s505_s11, %s500_s8 }
  0x1a   : > { %p504_p3 = pneg %p503_p2  ;;  %p508_p7 = por %p507_p5, %p506_p4 }
  0x1c   : > { %p509_p8 = pnand %p508_p7, %p504_p3 }
  0x1e   : > { %512 = shalt.err (!%p509_p8)
}
  0x1f   : > { %s513_s20 = scalar_lea.vmem %s684_s6, 768  ;;  %s594_s25 = smov [#allocation2]  }
  0x20   : > { %p514_p10 = scmp.ne.s32.totalorder %s684_s6, %s513_s20  ;;  %s518_s26 = sshll.u32 %s594_s25, 4  ;;  %s519_s26 = int_to_ptr.vmem [resolvable:$false] %s518_s26 }
  0x21   : > { %s520_s27 = scalar_lea.vmem %s519_s26, 1536  ;;  %p521_p2 = scmp.lt.s32.totalorder %s684_s6, %s519_s26 }
  0x22   : > { %p516_p9 = pnand %p514_p10, %p502_p1  ;;  %p522_p12 = scmp.lt.s32.totalorder %s520_s27, %s513_s20 }
  0x24   : > { %p517_p0 = pneg %p516_p9  ;;  %p523_p11 = por %p522_p12, %p521_p2 }
  0x26   : > { %p524_p6 = pnand %p523_p11, %p517_p0 }
  0x28   : > { %527 = shalt.err (!%p524_p6)
}
  0x29   : > { %s595_s28 = smov 128   ;;  %s596_s29 = smov 8  }
  0x2a   : > { %441 = dma.hbm_to_vmem [thread:$0]  (!%p680_p13), %s678_s30, 768, %s684_s6, %s686_s7, %s595_s28, %s595_s28, %s596_s29  }
  0x2b   : > { %p415_p9 = scmp.ge.s32.totalorder %s592_s15, 1  ;;  %p156_p1 = scmp.lt.s32.totalorder %s592_s15, 3 }
  0x2d   : > { %p157_p3 = pnand %p415_p9, %p156_p1 }
  0x2e   : > { %s710_s5 = sand.u32 (!%p157_p3), 1, %s584_s13   ;;  %p779_p6 = scmp.ne.s32.totalorder (!%p157_p3), %s775_s22, 0 }
  0x2f   : > { %160 = sbr.rel (%p157_p3) target bundleno = 609 (0x261), region = 32  ;;  %s163_s9 = scalar_lea.sflag (!%p157_p3), [#allocation3], %s710_s5 }
  0x30   : > { %s433_s8 = smul.u32 (!%p157_p3), 48, %s710_s5 }
  0x32   : > { %s166_s10 = scalar_lea.vmem (!%p157_p3), [#allocation2], %s433_s8 }
  0x34   : > { %571 = dma.done.wait (%p779_p6), %s163_s9, 768  }
  0x35   : > { %573 = vsyncadd (%p779_p6), %s163_s9, 4294966528  ;;  %v597_v0 = vmov 0   ;;  %v484_v1 = vld [vmem:[%s166_s10 + $0x24] ss:$8 sps:$4 sm:$0xff]   ;;  %v486_v2 = vld [vmem:[%s166_s10 + $0x20] ss:$8 sps:$4 sm:$0xff]  }
  0x36   : > { %281 = vmatprep.mubr.bf16.mxu0 %v597_v0  ;;  %483 = vset.pattern.permute.xlu0 %v597_v0  ;;  %v487_v3 = vld [vmem:[%s166_s10 + $0x14] ss:$8 sps:$4 sm:$0xff]   ;;  %v489_v4 = vld [vmem:[%s166_s10 + $0x10] ss:$8 sps:$4 sm:$0xff]   ;;  %v490_v5 = vld [vmem:[%s166_s10 + $0x4] ss:$8 sps:$4 sm:$0xff]  }
  0x37   : > { %259 = vmatprep.subr.bf16.mxu0 %v484_v1  ;;  %v193_v6 = vld [vmem:[%s771_s2 + $0x8] sm:$0xff]  ;;  %v192_v8 = vld [vmem:[%s771_s2] sm:$0xff]  ;;  %vm245_vm0 = vcmask 392192   ;;  %s416_s17 = sshll.u32 %s710_s5, 4  ;;  %s430_s19 = sshll.u32 %s640_s16, 8 }
  0x38   : > { %260 = vmatpush1.bf16.msra.mxu0 %v486_v2  ;;  %207 = vperm.xlu0 %483, %v193_v6   ;;  %v492_v7 = vld [vmem:[%s166_s10] ss:$8 sps:$4 sm:$0xff]   ;;  %s188_s20 = scalar_lea.vmem [#allocation5], %s416_s17  ;;  %s732_s28 = scalar_lea.hbm %s772_s3, %s430_s19 }
  0x39   : > { %261 = vmatprep.subr.bf16.mxu0 %v487_v3  ;;  %v493_v9 = vld [vmem:[%s770_s1] sm:$0xff]   ;;  %s341_s25 = sshll.u32 %s188_s20, 4  ;;  %s327_s29 = scalar_lea.sflag [#allocation4], %s710_s5  ;;  %s342_s25 = int_to_ptr.vmem [resolvable:$true] %s341_s25 }
  0x3a   : > { %s528_s8 = scalar_lea.vmem %s342_s25, 256  ;;  %p780_p12 = scmp.ne.s32.totalorder %s776_s23, 0 }
  0x3b   : > { %p529_p11 = scmp.ne.s32.totalorder %s342_s25, %s528_s8  ;;  %s598_s16 = smov [#allocation5]  }
  0x3c   : > { %262 = vmatpush1.bf16.msra.mxu0 %v489_v4  ;;  %202 = vperm.xlu0 %483, %v192_v8   ;;  %s532_s9 = sshll.u32 %s598_s16, 4  ;;  %s533_s9 = int_to_ptr.vmem [resolvable:$false] %s532_s9 }
  0x3d   : > { %263 = vmatprep.subr.bf16.mxu0 %v490_v5  ;;  %p530_p13 = pnand %p529_p11, %p780_p12  ;;  %s534_s10 = scalar_lea.vmem %s533_s9, 512 }
  0x3e   : > { %p535_p5 = scmp.lt.s32.totalorder %s342_s25, %s533_s9  ;;  %p536_p7 = scmp.lt.s32.totalorder %s534_s10, %s528_s8 }
  0x3f   : > { %p531_p4 = pneg %p530_p13 }
  0x40   : > { %264 = vmatpush1.bf16.msra.mxu0 %v492_v7  ;;  %p537_p8 = por %p536_p7, %p535_p5 }
  0x42   : > { %p538_p10 = pnand %p537_p8, %p531_p4 }
  0x43   : > { %424 = vmatmul.mubr.msk.bf16.vlgmr.msra.gmra.mxu0 %vm245_vm0, %v493_v9 }
  0xb3   : > { %v208_v12 = vpop.permute.xlu0 %207 }
  0xb7   : > { %v203_v19 = vpop.permute.xlu0 %202 }
 0x103   : > { %v283_v10 = vpop.f32.mrf.mxu0 }
 0x104   : > { %v284_v20 = vadd.f32 %v283_v10, %v203_v19 }
 0x105   : > { %v285_v11 = vpop.f32.mrf.mxu0 }
 0x106   : > { %v286_v21 = vadd.f32 %v285_v11, %v203_v19  ;;  %v294_v25 = vmul.f32 0.2, %v284_v20  ;;  %vm292_vm1 = vcmp.ge.f32.partialorder %v284_v20, 0.0 }
 0x107   : > { %v287_v13 = vpop.f32.mrf.mxu0 }
 0x108   : > { %v288_v14 = vadd.f32 %v287_v13, %v208_v12  ;;  %v295_v26 = vmul.f32 0.2, %v286_v21  ;;  %vm293_vm2 = vcmp.ge.f32.partialorder %v286_v21, 0.0  ;;  %v296_v30 = vsel %vm292_vm1, %v284_v20, %v294_v25 }
 0x109   : > { %v289_v15 = vpop.f32.mrf.mxu0 }
 0x10a   : > { %v298_v16 = vmul.f32 0.5, %v288_v14  ;;  %v290_v17 = vadd.f32 %v289_v15, %v208_v12  ;;  %v297_v31 = vsel %vm293_vm2, %v286_v21, %v295_v26 }
 0x10c   : > { %494 = vtanh.f32 %v298_v16  ;;  %v299_v18 = vmul.f32 0.5, %v290_v17 }
 0x10e   : > { %496 = vtanh.f32 %v299_v18 }
 0x119   : > { %v495_v22 = vpop.eup %494 }
 0x11a   : > { %v302_v23 = vadd.f32 1.0, %v495_v22 }
 0x11b   : > { %v497_v24 = vpop.eup %496 }
 0x11c   : > { %v303_v27 = vadd.f32 1.0, %v497_v24  ;;  %v304_v28 = vmul.f32 0.5, %v302_v23 }
 0x11e   : > { %v305_v29 = vmul.f32 0.5, %v303_v27  ;;  %v306_v32 = vmul.f32 %v304_v28, %v296_v30 }
 0x120   : > { %v307_v33 = vmul.f32 %v305_v29, %v297_v31 }
 0x122   : > { %v308_v34 = vadd.f32 %v307_v33, %v306_v32 }
 0x124   : > { %309 = vadd.xlane.f32.xlu1 %v308_v34 }
 0x1ad   : > { %v310_v35 = vpop.xlane.xlu1 %309 }
 0x1ae   : > { %v311_v36 = vmul.f32 0.00390625, %v310_v35 }
 0x1b0   : > { %v312_v37 = vsub.f32 %v306_v32, %v311_v36  ;;  %v313_v38 = vsub.f32 %v307_v33, %v311_v36 }
 0x1b2   : > { %v314_v39 = vmul.f32 %v312_v37, %v312_v37  ;;  %v315_v40 = vmul.f32 %v313_v38, %v313_v38 }
 0x1b4   : > { %v316_v41 = vadd.f32 %v315_v40, %v314_v39 }
 0x1b6   : > { %317 = vadd.xlane.f32.xlu1 %v316_v41 }
 0x23f   : > { %v318_v42 = vpop.xlane.xlu1 %317 }
 0x240   : > { %v319_v43 = vmul.f32 0.00390625, %v318_v42 }
 0x242   : > { %v320_v44 = vadd.f32 1e-05, %v319_v43 }
 0x244   : > { %498 = vrsqrt.f32 %v320_v44 }
 0x251   : > { %v499_v45 = vpop.eup %498 }
 0x252   : > { %v322_v46 = vmul.f32 %v499_v45, %v312_v37  ;;  %v323_v47 = vmul.f32 %v499_v45, %v313_v38 }
 0x254   : > { %324 = vst [vmem:[%s188_s20] sm:$0xff] %v322_v46  ;;  %325 = vst [vmem:[%s188_s20 + $0x8] sm:$0xff] %v323_v47 }
 0x255   : > { %541 = shalt.err (!%p538_p10)
}
 0x256   : > { %s542_s30 = scalar_lea.hbm %s732_s28, 256  ;;  %s546_s22 = scalar_lea.hbm %s772_s3, 512 }
 0x257   : > { %p543_p0 = scmp.ne.s32.totalorder %s732_s28, %s542_s30  ;;  %p547_p1 = scmp.lt.s32.totalorder %s732_s28, %s772_s3 }
 0x258   : > { %p548_p3 = scmp.lt.s32.totalorder %s546_s22, %s542_s30 }
 0x259   : > { %p544_p2 = pnand %p543_p0, %p780_p12 }
 0x25a   : > { %p549_p6 = por %p548_p3, %p547_p1 }
 0x25b   : > { %p545_p9 = pneg %p544_p2 }
 0x25d   : > { %p550_p11 = pnand %p549_p6, %p545_p9 }
 0x25f   : > { %553 = shalt.err (!%p550_p11)
}
 0x260   : > { %436 = dma.vmem_to_hbm [thread:$0]  (%p780_p12), %s342_s25, 256, %s732_s28, %s327_s29  }
 0x261 PF: > { %s353_s11 = sand.u32 1, %s580_s12   ;;  %p781_p13 = scmp.ne.s32.totalorder %s777_s24, 0 }
 0x262   : > { %p782_p4 = scmp.ge.s32.totalorder %s592_s15, 2  ;;  %s354_s17 = scalar_lea.sflag [#allocation4], %s353_s11 }
 0x264   : > { %p443_p5 = pnand %p782_p4, %p781_p13 }
 0x266   : > { %p444_p7 = pneg %p443_p5 }
 0x268   : > { %575 = dma.done.wait (%p444_p7), %s354_s17, 256  }
 0x269   : > { %577 = vsyncadd (%p444_p7), %s354_s17, 4294967040  ;;  %p16_p8 = scmp.ge.s32.totalorder %s644_s18, 4   ;;  %s783_s12 = smov %s584_s13 }
 0x26a   : > { %s784_s13 = smov %s588_s14  ;;  %s785_s14 = smov %s656_s21 }
 0x26b   : > { %s786_s15 = smov %s644_s18  ;;  %18 = sbr.rel (!%p16_p8) target bundleno = 5 (0x5), region = 77 }
 0x270   :  { %359 = vsyncpa [#allocation3], 1 }
 0x271   :  { %361 = vsyncpa [#allocation3 + $0x1], 1 }
 0x272   :  { %362 = vsyncpa [#allocation4], 1 }
 0x273   :  { %364 = vsyncpa [#allocation4 + $0x1], 1 }

</bundles_post_ra>
